<compile_context>
chip_gen: v7x
topology: tpu7x:2x2x1
jax: 0.10.0
libtpu: 0.0.40
codegen_flags: <defaults>
</compile_context>

<pallas_src>
import functools

import jax
import jax.numpy as jnp
from jax import lax
from jax.experimental import pallas as pl
from jax.experimental.pallas import tpu as pltpu


def _sepconv_kernel(xc_ref, halo_ref, dw_ref, pw_ref, pwb_ref, o_ref, *,
                    use_bf16_matmul):
    # xc_ref  : (1, C, S)       row tile of the input, spatial flattened (S = TH*W)
    # halo_ref: (1, 1, C, 2*W)  [row above | row below] per channel, zeros at border
    # dw_ref  : (C, 9)          depthwise 3x3 weights, taps on the last axis
    # pw_ref  : (Co, C)         pointwise 1x1 weights (block-diag when batch-folded)
    # pwb_ref : (Co, 1)         fused bias: pw_b + dw_b @ pw_w
    # o_ref   : (1, Co, S)
    C = xc_ref.shape[1]
    S = xc_ref.shape[2]
    W = halo_ref.shape[3] // 2

    x_mid = xc_ref[0].astype(jnp.float32)               # (C, S), aligned load
    halo = halo_ref[0, 0].astype(jnp.float32)           # (C, 2W)
    top = halo[:, :W]                                    # row above the tile
    bot = halo[:, W:]                                    # row below the tile

    # Vertically shifted row bands (shift by W lanes; the halo row fills the gap).
    if S == W:                                           # single-row tile
        x_up, x_dn = top, bot
    else:
        x_up = jnp.concatenate([top, x_mid[:, :S - W]], axis=1)
        x_dn = jnp.concatenate([x_mid[:, W:], bot], axis=1)

    # Left / right edge masks from an in-kernel iota (no DMA'd index tensor).
    col = lax.broadcasted_iota(jnp.int32, (1, S), 1) % W
    not_left = col != 0
    not_right = col != (W - 1)

    dwt = dw_ref[...].astype(jnp.float32)                # (C, 9), read once

    # Depthwise 3x3: 3 row values, horizontal taps via XLU rolls, edge masks
    # applied once per column group.  The lane that wraps at a row edge is
    # exactly the masked position, so the roll wrap is harmless.
    acc_l = jnp.zeros((C, S), jnp.float32)
    acc_m = jnp.zeros((C, S), jnp.float32)
    acc_r = jnp.zeros((C, S), jnp.float32)
    for ki, xs in enumerate((x_up, x_mid, x_dn)):
        acc_l = acc_l + pltpu.roll(xs, shift=1, axis=1) * dwt[:, 3 * ki + 0][:, None]
        acc_m = acc_m + xs * dwt[:, 3 * ki + 1][:, None]
        acc_r = acc_r + pltpu.roll(xs, shift=S - 1, axis=1) * dwt[:, 3 * ki + 2][:, None]
    acc = (acc_m
           + jnp.where(not_left, acc_l, 0.0)
           + jnp.where(not_right, acc_r, 0.0))

    # Pointwise 1x1 on the MXU, channels-first: (Co, C) @ (C, S).
    pw = pw_ref[...]
    if use_bf16_matmul:
        y = jnp.dot(pw.astype(jnp.bfloat16), acc.astype(jnp.bfloat16),
                    preferred_element_type=jnp.float32)
    else:
        y = jnp.dot(pw.astype(jnp.float32), acc, preferred_element_type=jnp.float32)
    y = y + pwb_ref[...].astype(jnp.float32)
    o_ref[0] = y.astype(o_ref.dtype)


def _vmem_limit_bytes():
    try:
        cap = int(pltpu.get_tpu_info().vmem_capacity_bytes)
    except Exception:
        cap = 64 * 1024 * 1024            # conservative fallback (v7x per-core VMEM)
    # ~96 MiB on v5e/v6e (128 MiB VMEM), ~48 MiB on v7x (64 MiB VMEM).
    return min(cap * 3 // 4, 100 * 1024 * 1024)


def _step_vmem_bytes(th, W, C, Co, itemsize):
    """Per-step working set: double-buffered in/out blocks + halo + f32 temporaries."""
    s = th * W
    blocks = 2 * (C + Co) * s * itemsize + 4 * C * W * itemsize
    temps = (8 * C + 2 * Co) * s * 4
    return blocks + temps


def _pick_batch_fold(N, Cin):
    """Fold NB images per grid step so the (NB*Cin, S) depthwise tile fills the
    8 f32 sublanes when the channel count is skinny."""
    if Cin >= 8:
        return 1
    best = 1
    for nb in range(2, N + 1):
        if N % nb == 0 and nb * Cin <= 8:
            best = nb
    return best


def _pick_row_tile(H, W, G, C, Co, itemsize, budget):
    def lane_ok(th):
        return (th * W) % 128 == 0

    divisors = [th for th in range(1, H + 1) if H % th == 0]
    cands = [th for th in divisors if lane_ok(th)]
    if not cands:
        # No 128-multiple lane width possible: whole image per step (masked stores).
        cands = [H]
    fitting = [th for th in cands if _step_vmem_bytes(th, W, C, Co, itemsize) <= budget]
    if not fitting:
        fitting = [min(cands)]
    best = max(fitting)
    # Guarantee >=2 grid steps when possible (v7x has 2 TensorCores per chip).
    if G * (H // best) < 2:
        multi = [th for th in fitting if H // th >= 2]
        if multi:
            best = max(multi)
    return best


def separable_conv2d(x, dw_w, dw_b, pw_w, pw_b, *, row_tile=None,
                     batch_fold=None, use_bf16_matmul=None):
    """SeparableConv2d forward.

    x    : (N, Cin, H, W)  NCHW, like the PyTorch module
    dw_w : (3, 3, Cin)     depthwise weight (== torch (Cin,1,3,3) rearranged)
    dw_b : (Cin,)          depthwise bias
    pw_w : (Cin, Cout)     pointwise weight (== torch (Cout,Cin,1,1) rearranged)
    pw_b : (Cout,)         pointwise bias
    returns (N, Cout, H, W)
    """
    N, Cin, H, W = x.shape
    Cout = pw_w.shape[1]
    itemsize = x.dtype.itemsize

    if use_bf16_matmul is None:
        use_bf16_matmul = min(Cin, Cout) >= 128

    NB = _pick_batch_fold(N, Cin) if batch_fold is None else batch_fold
    if N % NB != 0:
        raise ValueError(f"batch_fold {NB} must divide batch {N}")
    G = N // NB
    CE, CoE = NB * Cin, NB * Cout                 # folded channel counts

    vmem_limit = _vmem_limit_bytes()
    if row_tile is None:
        TH = _pick_row_tile(H, W, G, CE, CoE, itemsize, budget=int(vmem_limit * 0.7))
    else:
        TH = row_tile
        if H % TH != 0 or not ((TH * W) % 128 == 0 or TH == H):
            raise ValueError(f"invalid row_tile {TH} for H={H}, W={W}")
        if _step_vmem_bytes(TH, W, CE, CoE, itemsize) > vmem_limit:
            raise ValueError(f"row_tile {TH} exceeds the VMEM budget "
                             f"({vmem_limit} bytes); use a smaller tile")
    R = H // TH
    S = TH * W

    # Folded, flattened spatial view (contiguous reshape; no transpose, no HBM pad).
    x_flat = x.reshape(G, CE, H * W)

    # Halo rows (the single row above / below each row tile; zeros at the image
    # border), packed lane-dense as [top | bottom] on the last axis.
    zero_row = jnp.zeros((N, Cin, 1, W), x.dtype)
    if R > 1:
        top = jnp.concatenate([zero_row, x[:, :, TH - 1:H - 1:TH, :]], axis=2)  # (N,Cin,R,W)
        bot = jnp.concatenate([x[:, :, TH:H:TH, :], zero_row], axis=2)          # (N,Cin,R,W)
    else:
        top, bot = zero_row, zero_row
    halos = jnp.concatenate([top, bot], axis=3)                                 # (N,Cin,R,2W)
    halos = halos.reshape(G, NB, Cin, R, 2 * W).transpose(0, 3, 1, 2, 4)
    halos = halos.reshape(G, R, CE, 2 * W)

    # Weight / bias preparation (tiny, once, outside the kernel).
    dw_k = jnp.transpose(dw_w, (2, 0, 1)).reshape(Cin, 9).astype(jnp.float32)
    dw_k = jnp.tile(dw_k, (NB, 1))                                              # (CE, 9)
    pw_t = jnp.transpose(pw_w, (1, 0)).astype(jnp.float32)                      # (Cout, Cin)
    pw_k = jnp.kron(jnp.eye(NB, dtype=jnp.float32), pw_t)                       # (CoE, CE) block-diag
    pwb = (pw_b.astype(jnp.float32)
           + jnp.dot(dw_b.astype(jnp.float32), pw_w.astype(jnp.float32)))       # fused bias
    pwb_k = jnp.tile(pwb.reshape(Cout, 1), (NB, 1))                             # (CoE, 1)

    kernel = functools.partial(_sepconv_kernel, use_bf16_matmul=use_bf16_matmul)

    out_flat = pl.pallas_call(
        kernel,
        out_shape=jax.ShapeDtypeStruct((G, CoE, H * W), x.dtype),
        grid=(G, R),
        in_specs=[
            pl.BlockSpec((1, CE, S), lambda g, r: (g, 0, r)),
            pl.BlockSpec((1, 1, CE, 2 * W), lambda g, r: (g, r, 0, 0)),
            pl.BlockSpec((CE, 9), lambda g, r: (0, 0)),
            pl.BlockSpec((CoE, CE), lambda g, r: (0, 0)),
            pl.BlockSpec((CoE, 1), lambda g, r: (0, 0)),
        ],
        out_specs=pl.BlockSpec((1, CoE, S), lambda g, r: (g, 0, r)),
        compiler_params=pltpu.CompilerParams(
            dimension_semantics=("parallel", "parallel"),
            vmem_limit_bytes=vmem_limit),
    )(x_flat, halos, dw_k, pw_k, pwb_k)

    return out_flat.reshape(N, Cout, H, W)


def _reference(x_nchw, dw_w, dw_b, pw_w, pw_b):
    """Pure-JAX reference (lax.conv) for correctness checking."""
    x = jnp.transpose(x_nchw, (0, 2, 3, 1))  # NHWC
    Cin = x.shape[-1]
    dw_filter = dw_w.reshape(3, 3, 1, Cin)
    y = lax.conv_general_dilated(
        x, dw_filter, window_strides=(1, 1), padding=((1, 1), (1, 1)),
        dimension_numbers=("NHWC", "HWIO", "NHWC"),
        feature_group_count=Cin)
    y = y + dw_b
    pw_filter = pw_w.reshape(1, 1, *pw_w.shape)
    z = lax.conv_general_dilated(
        y, pw_filter, window_strides=(1, 1), padding=((0, 0), (0, 0)),
        dimension_numbers=("NHWC", "HWIO", "NHWC"))
    z = z + pw_b
    return jnp.transpose(z, (0, 3, 1, 2))


if __name__ == "__main__":
    key = jax.random.PRNGKey(0)
    N, Cin, Cout, H, W = 2, 4, 8, 16, 16

    k_x, k_dw, k_dwb, k_pw, k_pwb = jax.random.split(key, 5)
    x = jax.random.normal(k_x, (N, Cin, H, W), jnp.float32)
    # Deterministic "init" of module params (shapes match the nn.Conv2d defs):
    #   depthwise: weight (Cin,1,3,3) -> stored as (3,3,Cin); bias (Cin,)
    #   pointwise: weight (Cout,Cin,1,1) -> stored as (Cin,Cout); bias (Cout,)
    dw_w = jax.random.normal(k_dw, (3, 3, Cin), jnp.float32) * 0.1
    dw_b = jax.random.normal(k_dwb, (Cin,), jnp.float32) * 0.1
    pw_w = jax.random.normal(k_pw, (Cin, Cout), jnp.float32) * 0.1
    pw_b = jax.random.normal(k_pwb, (Cout,), jnp.float32) * 0.1

    ref = _reference(x, dw_w, dw_b, pw_w, pw_b)

    # Auto config: batch fold NB=2 (fills the 8 f32 sublanes), row tile TH=8
    # (>=2 grid steps for v7x dual TensorCores), lane-dense S=128 blocks.
    out = jax.block_until_ready(separable_conv2d(x, dw_w, dw_b, pw_w, pw_b))
    assert out.shape == (N, Cout, H, W)
    assert jnp.allclose(out, ref, atol=1e-5, rtol=1e-5), "mismatch vs reference (auto)"

    # No batch folding, explicit row tiling (grid = (2, 2)); exercises the
    # unfolded path and the cross-tile halo path.
    out_t = jax.block_until_ready(
        separable_conv2d(x, dw_w, dw_b, pw_w, pw_b, row_tile=8, batch_fold=1))
    assert jnp.allclose(out_t, ref, atol=1e-5, rtol=1e-5), \
        "mismatch vs reference (row_tile=8, fold=1)"

    print("KERNEL_OK")
</pallas_src>

<mosaic_0001>
module attributes {stable_mosaic.version = 11 : i64} {
  func.func @_sepconv_kernel(%arg0: i32, %arg1: i32, %arg2: memref<1x8x128xf32, #tpu.memory_space<vmem>>, %arg3: memref<1x1x8x32xf32, #tpu.memory_space<vmem>>, %arg4: memref<8x9xf32, #tpu.memory_space<vmem>>, %arg5: memref<16x8xf32, #tpu.memory_space<vmem>>, %arg6: memref<16x1xf32, #tpu.memory_space<vmem>>, %arg7: memref<1x16x128xf32, #tpu.memory_space<vmem>>) attributes {dimension_semantics = [#tpu.dimension_semantics<parallel>, #tpu.dimension_semantics<parallel>], iteration_bounds = array<i64: 1, 2>, scalar_prefetch = 0 : i64, scratch_operands = 0 : i64, tpu.core_type = #tpu.core_type<tc>, window_params = [{transform_indices = @transform_0, window_bounds = array<i64: 1, 8, 128>}, {transform_indices = @transform_1, window_bounds = array<i64: 1, 1, 8, 32>}, {pipeline_mode = #tpu.pipeline_mode<synchronous>, transform_indices = @transform_2, window_bounds = array<i64: 8, 9>}, {pipeline_mode = #tpu.pipeline_mode<synchronous>, transform_indices = @transform_3, window_bounds = array<i64: 16, 8>}, {pipeline_mode = #tpu.pipeline_mode<synchronous>, transform_indices = @transform_4, window_bounds = array<i64: 16, 1>}, {transform_indices = @transform_5, window_bounds = array<i64: 1, 16, 128>}]} {
    %c0 = arith.constant 0 : index
    %c0_0 = arith.constant 0 : index
    %c0_1 = arith.constant 0 : index
    %0 = vector.load %arg2[%c0, %c0_0, %c0_1] : memref<1x8x128xf32, #tpu.memory_space<vmem>>, vector<1x8x128xf32>
    %1 = vector.shape_cast %0 : vector<1x8x128xf32> to vector<8x128xf32>
    %c0_2 = arith.constant 0 : index
    %c0_3 = arith.constant 0 : index
    %c0_4 = arith.constant 0 : index
    %c0_5 = arith.constant 0 : index
    %2 = vector.load %arg3[%c0_2, %c0_3, %c0_4, %c0_5] : memref<1x1x8x32xf32, #tpu.memory_space<vmem>>, vector<1x1x8x32xf32>
    %3 = vector.shape_cast %2 : vector<1x1x8x32xf32> to vector<8x32xf32>
    %4 = vector.extract_strided_slice %3 {offsets = [0, 0], sizes = [8, 16], strides = [1, 1]} : vector<8x32xf32> to vector<8x16xf32>
    %5 = vector.extract_strided_slice %3 {offsets = [0, 16], sizes = [8, 16], strides = [1, 1]} : vector<8x32xf32> to vector<8x16xf32>
    %6 = vector.extract_strided_slice %1 {offsets = [0, 0], sizes = [8, 112], strides = [1, 1]} : vector<8x128xf32> to vector<8x112xf32>
    %7 = tpu.concatenate %4, %6 in 1 : vector<8x16xf32>, vector<8x112xf32> -> vector<8x128xf32>
    %8 = vector.extract_strided_slice %1 {offsets = [0, 16], sizes = [8, 112], strides = [1, 1]} : vector<8x128xf32> to vector<8x112xf32>
    %9 = tpu.concatenate %8, %5 in 1 : vector<8x112xf32>, vector<8x16xf32> -> vector<8x128xf32>
    %10 = tpu.iota {dimensions = array<i32: 1>} : vector<1x128xi32>
    %c16_i32 = arith.constant 16 : i32
    %c0_i32 = arith.constant 0 : i32
    %11 = arith.cmpi eq, %c16_i32, %c0_i32 : i32
    %c1_i32 = arith.constant 1 : i32
    %12 = arith.select %11, %c1_i32, %c16_i32 : i32
    %13 = vector.broadcast %12 : i32 to vector<1x128xi32>
    %14 = arith.remsi %10, %13 : vector<1x128xi32>
    %c0_i32_6 = arith.constant 0 : i32
    %15 = vector.broadcast %c0_i32_6 : i32 to vector<1x128xi32>
    %16 = arith.cmpi ne, %14, %15 : vector<1x128xi32>
    %c0_i32_7 = arith.constant 0 : i32
    %17 = vector.broadcast %c0_i32_7 : i32 to vector<1x128xi32>
    %18 = arith.cmpi slt, %14, %17 : vector<1x128xi32>
    %c0_i32_8 = arith.constant 0 : i32
    %19 = arith.cmpi slt, %12, %c0_i32_8 : i32
    %20 = vector.broadcast %19 : i1 to vector<1x128xi1>
    %21 = vector.broadcast %20 : vector<1x128xi1> to vector<1x128xi1>
    %22 = arith.xori %18, %21 : vector<1x128xi1>
    %23 = arith.andi %22, %16 : vector<1x128xi1>
    %24 = vector.broadcast %12 : i32 to vector<1x128xi32>
    %25 = arith.addi %14, %24 : vector<1x128xi32>
    %26 = arith.select %23, %25, %14 : vector<1x128xi1>, vector<1x128xi32>
    %c0_i32_9 = arith.constant 0 : i32
    %27 = vector.broadcast %c0_i32_9 : i32 to vector<1x128xi32>
    %28 = arith.cmpi ne, %26, %27 : vector<1x128xi32>
    %c15_i32 = arith.constant 15 : i32
    %29 = vector.broadcast %c15_i32 : i32 to vector<1x128xi32>
    %30 = arith.cmpi ne, %26, %29 : vector<1x128xi32>
    %c0_10 = arith.constant 0 : index
    %c0_11 = arith.constant 0 : index
    %31 = vector.load %arg4[%c0_10, %c0_11] : memref<8x9xf32, #tpu.memory_space<vmem>>, vector<8x9xf32>
    %cst = arith.constant 0.000000e+00 : f32
    %32 = vector.broadcast %cst : f32 to vector<8x128xf32>
    %cst_12 = arith.constant 0.000000e+00 : f32
    %33 = vector.broadcast %cst_12 : f32 to vector<8x128xf32>
    %cst_13 = arith.constant 0.000000e+00 : f32
    %34 = vector.broadcast %cst_13 : f32 to vector<8x128xf32>
    %c1_i32_14 = arith.constant 1 : i32
    %35 = tpu.dynamic_rotate %7 by %c1_i32_14 dim 1 : vector<8x128xf32>, i32 -> vector<8x128xf32>
    %36 = vector.extract_strided_slice %31 {offsets = [0, 0], sizes = [8, 1], strides = [1, 1]} : vector<8x9xf32> to vector<8x1xf32>
    %37 = vector.shape_cast %36 : vector<8x1xf32> to vector<8xf32>
    %38 = vector.shape_cast %37 : vector<8xf32> to vector<8x1xf32>
    %39 = vector.broadcast %38 : vector<8x1xf32> to vector<8x128xf32>
    %40 = arith.mulf %35, %39 : vector<8x128xf32>
    %41 = arith.addf %32, %40 : vector<8x128xf32>
    %42 = vector.extract_strided_slice %31 {offsets = [0, 1], sizes = [8, 1], strides = [1, 1]} : vector<8x9xf32> to vector<8x1xf32>
    %43 = vector.shape_cast %42 : vector<8x1xf32> to vector<8xf32>
    %44 = vector.shape_cast %43 : vector<8xf32> to vector<8x1xf32>
    %45 = vector.broadcast %44 : vector<8x1xf32> to vector<8x128xf32>
    %46 = arith.mulf %7, %45 : vector<8x128xf32>
    %47 = arith.addf %33, %46 : vector<8x128xf32>
    %c127_i32 = arith.constant 127 : i32
    %48 = tpu.dynamic_rotate %7 by %c127_i32 dim 1 : vector<8x128xf32>, i32 -> vector<8x128xf32>
    %49 = vector.extract_strided_slice %31 {offsets = [0, 2], sizes = [8, 1], strides = [1, 1]} : vector<8x9xf32> to vector<8x1xf32>
    %50 = vector.shape_cast %49 : vector<8x1xf32> to vector<8xf32>
    %51 = vector.shape_cast %50 : vector<8xf32> to vector<8x1xf32>
    %52 = vector.broadcast %51 : vector<8x1xf32> to vector<8x128xf32>
    %53 = arith.mulf %48, %52 : vector<8x128xf32>
    %54 = arith.addf %34, %53 : vector<8x128xf32>
    %c1_i32_15 = arith.constant 1 : i32
    %55 = tpu.dynamic_rotate %1 by %c1_i32_15 dim 1 : vector<8x128xf32>, i32 -> vector<8x128xf32>
    %56 = vector.extract_strided_slice %31 {offsets = [0, 3], sizes = [8, 1], strides = [1, 1]} : vector<8x9xf32> to vector<8x1xf32>
    %57 = vector.shape_cast %56 : vector<8x1xf32> to vector<8xf32>
    %58 = vector.shape_cast %57 : vector<8xf32> to vector<8x1xf32>
    %59 = vector.broadcast %58 : vector<8x1xf32> to vector<8x128xf32>
    %60 = arith.mulf %55, %59 : vector<8x128xf32>
    %61 = arith.addf %41, %60 : vector<8x128xf32>
    %62 = vector.extract_strided_slice %31 {offsets = [0, 4], sizes = [8, 1], strides = [1, 1]} : vector<8x9xf32> to vector<8x1xf32>
    %63 = vector.shape_cast %62 : vector<8x1xf32> to vector<8xf32>
    %64 = vector.shape_cast %63 : vector<8xf32> to vector<8x1xf32>
    %65 = vector.broadcast %64 : vector<8x1xf32> to vector<8x128xf32>
    %66 = arith.mulf %1, %65 : vector<8x128xf32>
    %67 = arith.addf %47, %66 : vector<8x128xf32>
    %c127_i32_16 = arith.constant 127 : i32
    %68 = tpu.dynamic_rotate %1 by %c127_i32_16 dim 1 : vector<8x128xf32>, i32 -> vector<8x128xf32>
    %69 = vector.extract_strided_slice %31 {offsets = [0, 5], sizes = [8, 1], strides = [1, 1]} : vector<8x9xf32> to vector<8x1xf32>
    %70 = vector.shape_cast %69 : vector<8x1xf32> to vector<8xf32>
    %71 = vector.shape_cast %70 : vector<8xf32> to vector<8x1xf32>
    %72 = vector.broadcast %71 : vector<8x1xf32> to vector<8x128xf32>
    %73 = arith.mulf %68, %72 : vector<8x128xf32>
    %74 = arith.addf %54, %73 : vector<8x128xf32>
    %c1_i32_17 = arith.constant 1 : i32
    %75 = tpu.dynamic_rotate %9 by %c1_i32_17 dim 1 : vector<8x128xf32>, i32 -> vector<8x128xf32>
    %76 = vector.extract_strided_slice %31 {offsets = [0, 6], sizes = [8, 1], strides = [1, 1]} : vector<8x9xf32> to vector<8x1xf32>
    %77 = vector.shape_cast %76 : vector<8x1xf32> to vector<8xf32>
    %78 = vector.shape_cast %77 : vector<8xf32> to vector<8x1xf32>
    %79 = vector.broadcast %78 : vector<8x1xf32> to vector<8x128xf32>
    %80 = arith.mulf %75, %79 : vector<8x128xf32>
    %81 = arith.addf %61, %80 : vector<8x128xf32>
    %82 = vector.extract_strided_slice %31 {offsets = [0, 7], sizes = [8, 1], strides = [1, 1]} : vector<8x9xf32> to vector<8x1xf32>
    %83 = vector.shape_cast %82 : vector<8x1xf32> to vector<8xf32>
    %84 = vector.shape_cast %83 : vector<8xf32> to vector<8x1xf32>
    %85 = vector.broadcast %84 : vector<8x1xf32> to vector<8x128xf32>
    %86 = arith.mulf %9, %85 : vector<8x128xf32>
    %87 = arith.addf %67, %86 : vector<8x128xf32>
    %c127_i32_18 = arith.constant 127 : i32
    %88 = tpu.dynamic_rotate %9 by %c127_i32_18 dim 1 : vector<8x128xf32>, i32 -> vector<8x128xf32>
    %89 = vector.extract_strided_slice %31 {offsets = [0, 8], sizes = [8, 1], strides = [1, 1]} : vector<8x9xf32> to vector<8x1xf32>
    %90 = vector.shape_cast %89 : vector<8x1xf32> to vector<8xf32>
    %91 = vector.shape_cast %90 : vector<8xf32> to vector<8x1xf32>
    %92 = vector.broadcast %91 : vector<8x1xf32> to vector<8x128xf32>
    %93 = arith.mulf %88, %92 : vector<8x128xf32>
    %94 = arith.addf %74, %93 : vector<8x128xf32>
    %cst_19 = arith.constant 0.000000e+00 : f32
    %95 = vector.shape_cast %28 : vector<1x128xi1> to vector<1x128xi1>
    %96 = vector.broadcast %95 : vector<1x128xi1> to vector<8x128xi1>
    %97 = vector.broadcast %cst_19 : f32 to vector<8x128xf32>
    %98 = arith.select %96, %81, %97 : vector<8x128xi1>, vector<8x128xf32>
    %99 = arith.addf %87, %98 : vector<8x128xf32>
    %cst_20 = arith.constant 0.000000e+00 : f32
    %100 = vector.shape_cast %30 : vector<1x128xi1> to vector<1x128xi1>
    %101 = vector.broadcast %100 : vector<1x128xi1> to vector<8x128xi1>
    %102 = vector.broadcast %cst_20 : f32 to vector<8x128xf32>
    %103 = arith.select %101, %94, %102 : vector<8x128xi1>, vector<8x128xf32>
    %104 = arith.addf %99, %103 : vector<8x128xf32>
    %c0_21 = arith.constant 0 : index
    %c0_22 = arith.constant 0 : index
    %105 = vector.load %arg5[%c0_21, %c0_22] : memref<16x8xf32, #tpu.memory_space<vmem>>, vector<16x8xf32>
    %cst_23 = arith.constant dense<0.000000e+00> : vector<16x128xf32>
    %106 = tpu.matmul %105, %104, %cst_23 {dimension_numbers = #tpu.dot_dimension_numbers<[1], [0], [0], [1], [0, 0, 1, 1], [], []>} : vector<16x8xf32>, vector<8x128xf32>, vector<16x128xf32> -> vector<16x128xf32>
    %c0_24 = arith.constant 0 : index
    %c0_25 = arith.constant 0 : index
    %107 = vector.load %arg6[%c0_24, %c0_25] : memref<16x1xf32, #tpu.memory_space<vmem>>, vector<16x1xf32>
    %108 = vector.broadcast %107 : vector<16x1xf32> to vector<16x128xf32>
    %109 = arith.addf %106, %108 : vector<16x128xf32>
    %c0_26 = arith.constant 0 : index
    %c0_27 = arith.constant 0 : index
    %c0_28 = arith.constant 0 : index
    %110 = vector.load %arg7[%c0_26, %c0_27, %c0_28] : memref<1x16x128xf32, #tpu.memory_space<vmem>>, vector<1x16x128xf32>
    %111 = vector.shape_cast %110 : vector<1x16x128xf32> to vector<16x128xf32>
    %112 = vector.shape_cast %109 : vector<16x128xf32> to vector<1x16x128xf32>
    tpu.vector_store %arg7[%c0_26, %c0_27, %c0_28], %112 {strides = array<i32>} : memref<1x16x128xf32, #tpu.memory_space<vmem>>, vector<1x16x128xf32>,
    return
  }
  func.func @transform_0(%arg0: i32, %arg1: i32) -> (i32, i32, i32) {
    %c0_i32 = arith.constant 0 : i32
    %c0_i32_0 = arith.constant 0 : i32
    return %arg0, %c0_i32, %arg1 : i32, i32, i32
  }
  func.func @transform_1(%arg0: i32, %arg1: i32) -> (i32, i32, i32, i32) {
    %c0_i32 = arith.constant 0 : i32
    %c0_i32_0 = arith.constant 0 : i32
    %c0_i32_1 = arith.constant 0 : i32
    return %arg0, %arg1, %c0_i32, %c0_i32_0 : i32, i32, i32, i32
  }
  func.func @transform_2(%arg0: i32, %arg1: i32) -> (i32, i32) {
    %c0_i32 = arith.constant 0 : i32
    %c0_i32_0 = arith.constant 0 : i32
    %c0_i32_1 = arith.constant 0 : i32
    return %c0_i32, %c0_i32_0 : i32, i32
  }
  func.func @transform_3(%arg0: i32, %arg1: i32) -> (i32, i32) {
    %c0_i32 = arith.constant 0 : i32
    %c0_i32_0 = arith.constant 0 : i32
    %c0_i32_1 = arith.constant 0 : i32
    return %c0_i32, %c0_i32_0 : i32, i32
  }
  func.func @transform_4(%arg0: i32, %arg1: i32) -> (i32, i32) {
    %c0_i32 = arith.constant 0 : i32
    %c0_i32_0 = arith.constant 0 : i32
    %c0_i32_1 = arith.constant 0 : i32
    return %c0_i32, %c0_i32_0 : i32, i32
  }
  func.func @transform_5(%arg0: i32, %arg1: i32) -> (i32, i32, i32) {
    %c0_i32 = arith.constant 0 : i32
    %c0_i32_0 = arith.constant 0 : i32
    return %arg0, %c0_i32, %arg1 : i32, i32, i32
  }
}

</mosaic_0001>

<bundles_post_ra>
// kernel: tpu_custom_call.1
= control target key start
LH: loop header
LB: loop body
LE: loop exit
PB: predicated region body
PF: predicated region fallthrough
CT: control target
= control target key end

     0   :  { %10 = vsyncpa [#allocation3], 0  ;;  %s965_s0 = inlined_call_operand.vmem [shape: f32[1,8,256], index: 0, kind: input, shape index: {}]   ;;  %s966_s1 = inlined_call_operand.vmem [shape: f32[1,2,8,32], index: 1, kind: input, shape index: {}]   ;;  %s967_s2 = inlined_call_operand.vmem [shape: f32[8,9], index: 2, kind: input, shape index: {}]   ;;  %s968_s3 = inlined_call_operand.vmem [shape: f32[16,8], index: 3, kind: input, shape index: {}]   ;;  %s969_s4 = inlined_call_operand.vmem [shape: f32[16,1], index: 4, kind: input, shape index: {}]   ;;  %s970_s5 = inlined_call_operand.hbm [shape: f32[1,16,256], index: 5, kind: output, shape index: {}]  }
   0x1   :  { %12 = vsyncpa [#allocation3 + $0x1], 0  ;;  %s830_s18 = smov 0   ;;  %s832_s19 = smov 0  }
   0x2   :  { %s834_s20 = smov 0   ;;  %s836_s21 = smov 0  }
   0x3   :  { %s838_s22 = smov 0   ;;  %s840_s23 = smov 0  }
   0x4 LB: > { %s597_s24 = sadd.s32 4294967295, %s780_s23   ;;  %s598_s25 = sadd.s32 4294967294, %s780_s23   ;;  %s780_s23 = sphi %s840_s23, %s18_s23   ;;  %s776_s22 = sphi %s838_s22, %s977_s22   ;;  %s772_s21 = sphi %s836_s21, %s976_s21   ;;  %s768_s20 = sphi %s834_s20, %s975_s20   ;;  %s764_s19 = sphi %s832_s19, %s974_s19   ;;  %s760_s18 = sphi %s830_s18, %s973_s18  }
   0x5   : > { %s27_s26 = sadd.s32 1, %s776_s22  ;;  %s158_s27 = sadd.s32 1, %s768_s20 }
   0x6   : > { %p28_p0 = scmp.ge.s32.totalorder %s27_s26, 2  ;;  %p168_p1 = scmp.ne.s32.totalorder %s768_s20, %s764_s19 }
   0x7   : > { %p169_p2 = scmp.eq.s32.totalorder %s597_s24, 1  ;;  %p174_p3 = scmp.ne.s32.totalorder %s764_s19, %s760_s18 }
   0x8   : > { %s979_s26 = smov (%p28_p0, %s27_s26), 0  ;;  %p175_p5 = scmp.eq.s32.totalorder %s598_s25, 1 }
   0x9   : > { %p870_p4 = por %p169_p2, %p168_p1  ;;  %s154_s29 = ssub.s32 %s776_s22, %s979_s26 }
   0xa   : > { %p601_p6 = scmp.ge.s32.totalorder %s780_s23, 1  ;;  %p156_p7 = scmp.eq.s32.totalorder %s154_s29, 0 }
   0xb   : > { %p877_p8 = por %p175_p5, %p174_p3  ;;  %p224_p9 = scmp.lt.s32.totalorder %s780_s23, 3 }
   0xc   : > { %s883_s6 = scalar_select %p156_p7, %s768_s20, %s158_s27  }
   0xd   : > { %p225_p10 = pnand %p601_p6, %p224_p9 }
   0xe   : > { %p265_p11 = scmp.lt.s32.totalorder (!%p225_p10), %s772_s21, 1  ;;  %v782_v0 = vmov (!%p225_p10), 0   ;;  %v783_v1 = vmov (!%p225_p10), 3   ;;  %s784_s15 = smov (!%p225_p10), 96   ;;  %v312_v4 = vld [vmem:[%s967_s2] sm:$0xff] (!%p225_p10)  ;;  %v787_v5 = vmov (!%p225_p10), 1   ;;  %v296_v36 = vlaneseq (!%p225_p10) }
   0xf   : > { %228 = sbr.rel (%p225_p10) target bundleno = 509 (0x1fd), region = 40  ;;  %691 = vset.pattern.permute.xlu1 (!%p225_p10), %v782_v0  ;;  %692 = vset.pattern.permute.xlu0 (!%p225_p10), %v783_v1  ;;  %s785_s16 = smov (!%p225_p10), 16   ;;  %v788_v6 = vmov (!%p225_p10), 2   ;;  %v789_v7 = vmov (!%p225_p10), 4   ;;  %v790_v8 = vmov (!%p225_p10), 7   ;;  %v791_v9 = vmov (!%p225_p10), 5  }
  0x10   : > { %s786_s25 = smov (!%p225_p10), 112   ;;  %s792_s27 = smov (!%p225_p10), 1   ;;  %v793_v10 = vmov (!%p225_p10), 6   ;;  %v795_v11 = vmov (!%p225_p10), 8   ;;  %vm285_vm0 = vcmask (!%p225_p10), 130048   ;;  %vm294_vm1 = vcmask (!%p225_p10), 916480  }
  0x11   : > { %s794_s29 = smov (!%p225_p10), 127   ;;  %v388_v17 = vld [vmem:[%s968_s3] sm:$0xff] (!%p225_p10)  ;;  %vm402_vm2 = vcmask (!%p225_p10), 64512   ;;  %v391_v18 = vld [vmem:[%s969_s4 + $0x8] sm:$0xff] (!%p225_p10)  ;;  %v297_v39 = vand.u32 (!%p225_p10), 127, %v296_v36  ;;  %s796_s9 = smov (!%p225_p10), [#allocation2]  }
  0x12   : > { %616 = vmatprep.mubr.msk.f32.mxu0 (!%p225_p10), %vm402_vm2, %v388_v17  ;;  %v390_v19 = vld [vmem:[%s969_s4] sm:$0xff] (!%p225_p10)  ;;  %v389_v57 = vld [vmem:[%s968_s3 + $0x8] sm:$0xff] (!%p225_p10)  ;;  %s706_s10 = sshll.u32 (!%p225_p10), %s796_s9, 4  ;;  %s707_s10 = int_to_ptr.vmem [resolvable:$false] %s706_s10 }
  0x13   : > { %v302_v47 = vand.u32 (!%p225_p10), 15, %v297_v39 }
  0x15   : > { %vm310_vm3 = vcmp.ne.s32.totalorder (!%p225_p10), %v302_v47, 0  ;;  %vm311_vm4 = vcmp.ne.s32.totalorder (!%p225_p10), %v302_v47, 15 }
  0x16   : > { %s266_s7 = scalar_select %p265_p11, %s772_s21, 1 }
  0x18   : > { %s603_s8 = sshll.u32 %s266_s7, 3 }
  0x19   : > { %s278_s11 = scalar_lea.vmem %s966_s1, %s603_s8  ;;  %s270_s14 = scalar_lea.vmem %s965_s0, %s603_s8 }
  0x1a   : > { %v280_v2 = vld [vmem:[%s278_s11] sm:$0xff]  ;;  %s708_s11 = scalar_lea.vmem %s707_s10, 512 }
  0x1b   : > { %v279_v3 = vld [vmem:[%s270_s14] sm:$0xff]  ;;  %291 = vrot.lane.b32.xlu1 %v280_v2, %s784_s15  ;;  %s260_s15 = sand.u32 1, %s764_s19  }
  0x1c   : > { %282 = vrot.lane.b32.xlu0 %v279_v3, %s785_s16  ;;  %s602_s16 = sshll.u32 %s260_s15, 4  ;;  %s919_s8 = scalar_lea.sflag [#allocation3], %s260_s15 }
  0x1d   : > { %s262_s17 = scalar_lea.vmem [#allocation2], %s602_s16 }
  0x1e   : > { %s501_s24 = sshll.u32 %s262_s17, 4  ;;  %s912_s24 = int_to_ptr.vmem [resolvable:$true] %s501_s24 }
  0x1f   : > { %317 = vperm.xlu1 %691, %v312_v4   ;;  %p709_p1 = scmp.lt.s32.totalorder %s912_s24, %s707_s10 }
  0x20   : > { %287 = vrot.lane.b32.xlu0 %v279_v3, %s786_s25  ;;  %s608_s25 = sshll.u32 %s772_s21, 7  ;;  %s702_s21 = scalar_lea.vmem %s912_s24, 256 }
  0x21   : > { %s917_s7 = scalar_lea.hbm %s970_s5, %s608_s25  ;;  %p703_p12 = scmp.ne.s32.totalorder %s912_s24, %s702_s21 }
  0x22   : > { %p710_p2 = scmp.lt.s32.totalorder %s708_s11, %s702_s21 }
  0x23   : > { %693 = vset.pattern.permute.xlu1 %v787_v5  ;;  %p704_p13 = pnand %p703_p12, %p870_p4 }
  0x24   : > { %339 = vperm.xlu0 %692, %v312_v4   ;;  %323 = vperm.xlu1 %693, %v312_v4   ;;  %p711_p3 = por %p710_p2, %p709_p1 }
  0x25   : > { %p705_p0 = pneg %p704_p13 }
  0x27   : > { %p712_p5 = pnand %p711_p3, %p705_p0 }
  0x28   : > { %695 = vset.pattern.permute.xlu0 %v788_v6  ;;  %694 = vset.pattern.permute.xlu1 %v789_v7 }
  0x29   : > { %331 = vperm.xlu0 %695, %v312_v4   ;;  %345 = vperm.xlu1 %694, %v312_v4  }
  0x2d   : > { %698 = vset.pattern.permute.xlu0 %v790_v8  ;;  %696 = vset.pattern.permute.xlu1 %v791_v9 }
  0x2e   : > { %367 = vperm.xlu0 %698, %v312_v4   ;;  %353 = vperm.xlu1 %696, %v312_v4  }
  0x32   : > { %336 = vrot.lane.b32.xlu0 %v279_v3, %s792_s27  ;;  %697 = vset.pattern.permute.xlu1 %v793_v10 }
  0x33   : > { %701 = vset.pattern.permute.xlu0 %v782_v0  ;;  %361 = vperm.xlu1 %697, %v312_v4  }
  0x36   : > { %350 = vrot.lane.b32.xlu0 %v279_v3, %s794_s29 }
  0x37   : > { %699 = vset.pattern.permute.xlu1 %v795_v11 }
  0x38   : > { %375 = vperm.xlu1 %699, %v312_v4  }
  0x3c   : > { %700 = vset.pattern.permute.xlu1 %v782_v0 }
  0x8d   : > { %v292_v14 = vpop.permute.xlu1 %291 }
  0x8e   : > { %v283_v12 = vpop.permute.xlu0 %282 }
  0x8f   : > { %v286_v13 = vsel %vm285_vm0, %v280_v2, %v283_v12 }
  0x90   : > { %313 = vrot.lane.b32.xlu1 %v286_v13, %s792_s27 }
  0x92   : > { %v288_v15 = vpop.permute.xlu0 %287 }
  0x93   : > { %v295_v16 = vsel %vm294_vm1, %v288_v15, %v292_v14 }
  0x94   : > { %328 = vrot.lane.b32.xlu1 %v286_v13, %s794_s29  ;;  %372 = vrot.lane.b32.xlu0 %v295_v16, %s794_s29 }
  0x98   : > { %358 = vrot.lane.b32.xlu1 %v295_v16, %s792_s27  ;;  %399 = vperm.xlu0 %701, %v391_v18  }
  0x9c   : > { %394 = vperm.xlu1 %700, %v390_v19  }
  0x9e   : > { %v318_v20 = vpop.permute.xlu1 %317 }
  0xa3   : > { %v340_v21 = vpop.permute.xlu0 %339  ;;  %v324_v22 = vpop.permute.xlu1 %323 }
  0xa4   : > { %v326_v26 = vmul.f32 %v324_v22, %v286_v13 }
  0xa8   : > { %v332_v23 = vpop.permute.xlu0 %331  ;;  %v346_v24 = vpop.permute.xlu1 %345 }
  0xa9   : > { %v348_v25 = vmul.f32 %v346_v24, %v279_v3 }
  0xab   : > { %v349_v28 = vadd.f32 %v348_v25, %v326_v26 }
  0xad   : > { %v368_v27 = vpop.permute.xlu0 %367  ;;  %v354_v31 = vpop.permute.xlu1 %353 }
  0xae   : > { %v370_v29 = vmul.f32 %v368_v27, %v295_v16 }
  0xb0   : > { %v371_v30 = vadd.f32 %v370_v29, %v349_v28 }
  0xb1   : > { %v337_v34 = vpop.permute.xlu0 %336 }
  0xb2   : > { %v362_v32 = vpop.permute.xlu1 %361  ;;  %v342_v44 = vmul.f32 %v340_v21, %v337_v34 }
  0xb5   : > { %v351_v37 = vpop.permute.xlu0 %350 }
  0xb6   : > { %v356_v40 = vmul.f32 %v354_v31, %v351_v37 }
  0xb7   : > { %v376_v33 = vpop.permute.xlu1 %375 }
 0x102   : > { %v314_v35 = vpop.permute.xlu1 %313 }
 0x103   : > { %v320_v41 = vmul.f32 %v318_v20, %v314_v35 }
 0x105   : > { %v343_v48 = vadd.f32 %v342_v44, %v320_v41 }
 0x106   : > { %v329_v38 = vpop.permute.xlu1 %328  ;;  %v373_v43 = vpop.permute.xlu0 %372 }
 0x107   : > { %v334_v42 = vmul.f32 %v332_v23, %v329_v38  ;;  %v378_v49 = vmul.f32 %v376_v33, %v373_v43 }
 0x109   : > { %v357_v45 = vadd.f32 %v356_v40, %v334_v42 }
 0x10a   : > { %v359_v46 = vpop.permute.xlu1 %358 }
 0x10b   : > { %v364_v50 = vmul.f32 %v362_v32, %v359_v46  ;;  %v379_v51 = vadd.f32 %v378_v49, %v357_v45 }
 0x10d   : > { %v365_v52 = vadd.f32 %v364_v50, %v343_v48  ;;  %v386_v55 = vsel %vm311_vm4, %v379_v51, 0.0 }
 0x10f   : > { %v382_v53 = vsel %vm310_vm3, %v365_v52, 0.0 }
 0x110   : > { %v383_v54 = vadd.f32 %v382_v53, %v371_v30 }
 0x112   : > { %v387_v56 = vadd.f32 %v386_v55, %v383_v54 }
 0x114   : > { %614 = vmatprep.subr.mxu0 %v387_v56 }
 0x115   : > { %615 = vmatpush3.msra.mxu0 %v387_v56 }
 0x116   : > { %617 = vmatmul.mubr.msk.f32.vlgmr.msra.gmra.mrb[0].mxu0 %vm402_vm2, %v389_v57 }
 0x117   : > { %v400_v58 = vpop.permute.xlu0 %399 }
 0x11b   : > { %v395_v59 = vpop.permute.xlu1 %394 }
 0x1e9   : > { %v618_v60 = vpop.f32.mrb[0].mxu0 }
 0x1ea   : > { %v481_v61 = vadd.f32 %v618_v60, %v400_v58  ;;  %v475_v62 = vpop.f32.mrb[1].mxu0 }
 0x1eb   : > { %v476_v63 = vadd.f32 %v475_v62, %v395_v59 }
 0x1ec   : > { %485 = vst [vmem:[%s262_s17 + $0x8] sm:$0xff] %v481_v61 }
 0x1ed   : > { %484 = vst [vmem:[%s262_s17] sm:$0xff] %v476_v63 }
 0x1ee   : > { %715 = shalt.err (!%p712_p5)
}
 0x1ef   : > { %s716_s12 = scalar_lea.hbm %s917_s7, 256  ;;  %s720_s15 = scalar_lea.hbm %s970_s5, 512 }
 0x1f0   : > { %p717_p6 = scmp.ne.s32.totalorder %s917_s7, %s716_s12  ;;  %p721_p10 = scmp.lt.u32.totalorder %s917_s7, %s970_s5 }
 0x1f1   : > { %p722_p11 = scmp.lt.u32.totalorder %s720_s15, %s716_s12  ;;  %p724_p13 = scmp.lt.u32.totalorder %s716_s12, %s917_s7 }
 0x1f2   : > { %p718_p7 = pnand %p717_p6, %p870_p4 }
 0x1f3   : > { %p723_p12 = por %p722_p11, %p721_p10 }
 0x1f4   : > { %p719_p9 = pneg %p718_p7 }
 0x1f5   : > { %p725_p0 = por %p724_p13, %p723_p12 }
 0x1f7   : > { %p726_p1 = pnand %p725_p0, %p719_p9 }
 0x1f9   : > { %729 = shalt.err (!%p726_p1)
}
 0x1fa   : > { %s797_s25 = smov 128   ;;  %s798_s27 = smov 256  }
 0x1fb   : > { %s799_s29 = smov 8  }
 0x1fc   : > { %619 = dma.vmem_to_hbm [thread:$0]  (%p870_p4), %s912_s24, 256, %s917_s7, %s919_s8, %s797_s25, %s798_s27, %s799_s29  }
 0x1fd PF: > { %p625_p2 = scmp.ge.s32.totalorder %s780_s23, 2  ;;  %s516_s21 = sand.u32 1, %s760_s18  }
 0x1fe   : > { %s517_s9 = scalar_lea.sflag [#allocation3], %s516_s21 }
 0x1ff   : > { %p622_p3 = pnand %p625_p2, %p877_p8 }
 0x201   : > { %755 = dma.done.wait (!%p622_p3), %s517_s9, 256  }
 0x202   : > { %757 = vsyncadd (!%p622_p3), %s517_s9, 4294967040  ;;  %s18_s23 = sadd.s32 1, %s780_s23   ;;  %s973_s18 = smov %s764_s19 }
 0x203   : > { %p15_p5 = scmp.ge.s32.totalorder %s18_s23, 4   ;;  %s974_s19 = smov %s768_s20 }
 0x204   : > { %s975_s20 = smov %s883_s6  ;;  %s976_s21 = smov %s776_s22 }
 0x205   : > { %s977_s22 = smov %s979_s26  ;;  %17 = sbr.rel (!%p15_p5) target bundleno = 4 (0x4), region = 78 }
 0x20c   :  { %522 = vsyncpa [#allocation3], 1 }
 0x20d   :  { %524 = vsyncpa [#allocation3 + $0x1], 1 }

</bundles_post_ra>
